<compile_context>
chip_gen: v5e
topology: v5e:2x2
jax: 0.10.0
libtpu: 0.0.40
codegen_flags: <defaults>
</compile_context>

<pallas_src>
import jax
import jax.numpy as jnp
from jax.experimental import pallas as pl
from jax.experimental.pallas import tpu as pltpu


def _round_up(x: int, m: int) -> int:
    return (x + m - 1) // m * m


# --------------------------------------------------------------------------
# Pallas kernel: tiled LM-head projection  (M, H) @ (H, V) + b -> (M, V) f32
# --------------------------------------------------------------------------
def _lm_head_kernel(x_ref, w_ref, b_ref, o_ref):
    # x_ref: (tm, tk) bf16   w_ref: (tk, tn) bf16   b_ref: (1, tn) f32
    # o_ref: (tm, tn) f32 — its block index (i, j) is invariant across k, so
    # it stays resident in VMEM for the whole K loop and doubles as the f32
    # accumulator (no separate scratch, no finalize copy).
    @pl.when(pl.program_id(2) == 0)
    def _init():
        o_ref[...] = jnp.broadcast_to(b_ref[...], o_ref.shape)

    o_ref[...] += jnp.dot(
        x_ref[...], w_ref[...], preferred_element_type=jnp.float32
    )


def _vmem_capacity_bytes() -> int:
    try:
        return int(pltpu.get_tpu_info().vmem_capacity_bytes)
    except Exception:
        return 64 * 1024 * 1024  # conservative per-TC default (v7x-sized)


def _working_set_bytes(tm: int, tn: int, tk: int) -> int:
    return (
        2 * tm * tk * 2      # x tiles, bf16, double-buffered
        + 2 * tk * tn * 2    # w tiles, bf16, double-buffered
        + 2 * tm * tn * 4    # out tiles (accumulator), f32, double-buffered
        + 2 * 1 * tn * 4     # bias tiles, f32
    )


def _choose_tiles(M: int, Hp: int, Vp: int, budget_bytes: int):
    """Pick (tm, tn, tk).  Priority: maximize tm (minimizes weight re-reads),
    then maximize tk (fewer K steps / grid-step overhead)."""
    M8 = _round_up(max(M, 1), 8)
    tn = next(c for c in (512, 256, 128) if Vp % c == 0)
    tk_cands = sorted(
        {
            c
            for c in ((Hp,) if Hp <= 4096 else ()) + (2048, 1024, 512, 256, 128)
            if c <= Hp and Hp % c == 0
        },
        reverse=True,
    )
    best = None
    for tk in tk_cands:
        const = 2 * tk * tn * 2 + 2 * tn * 4        # weight + bias buffers
        per_row = 4 * tk + 8 * tn                   # x dbuf + out dbuf, per tm row
        tm_max = (budget_bytes - const) // per_row
        if tm_max < 8:
            continue
        tm = min(M8, (tm_max // 8) * 8)
        if best is None or (tm, tk) > best:
            best = (tm, tk)
    if best is None:
        best = (8, 128)
    tm, tk = best
    return tm, tn, tk


def lm_head_pallas(x, w, b):
    """Tiled LM-head projection on TPU.

    x: (M, H)  activations (any float; cast to bf16 inside)
    w: (Hw, V) weights, Hw >= H (extra rows multiply zero-padded x rows)
    b: (V,) or (1, V) bias
    returns (M, V) float32 logits, V = w.shape[1].
    """
    M, H = x.shape
    Hw, V = w.shape
    assert Hw >= H
    b2 = jnp.asarray(b, jnp.float32).reshape(1, V)

    Hp = _round_up(Hw, 128)
    Vp = _round_up(V, 128)

    vmem_cap = _vmem_capacity_bytes()
    budget = int(vmem_cap * 0.70)          # ~90 MiB on v5e/v6e, ~45 MiB on v7x
    tm, tn, tk = _choose_tiles(M, Hp, Vp, budget)
    Mp = _round_up(M, tm)

    x_bf = x.astype(jnp.bfloat16)
    if (Mp, Hp) != (M, H):
        x_bf = jnp.pad(x_bf, ((0, Mp - M), (0, Hp - H)))   # zero K-pad is exact
    w_bf = w.astype(jnp.bfloat16)
    if (Hp, Vp) != (Hw, V):                                # no-op when pre-padded at init
        w_bf = jnp.pad(w_bf, ((0, Hp - Hw), (0, Vp - V)))
    if Vp != V:
        b2 = jnp.pad(b2, ((0, 0), (0, Vp - V)))

    gm, gn, gk = Mp // tm, Vp // tn, Hp // tk

    ws = _working_set_bytes(tm, tn, tk)
    vmem_limit = max(int(ws * 1.25), 32 * 1024 * 1024)     # exact working set + headroom
    vmem_limit = min(vmem_limit, int(vmem_cap * 0.82))     # never the full physical VMEM

    cost = pl.CostEstimate(
        flops=2 * Mp * Hp * Vp,
        transcendentals=0,
        bytes_accessed=(
            Mp * Hp * 2 * gn        # activations re-read once per N tile
            + Hp * Vp * 2 * gm      # weights re-read once per M tile (gm == 1 when tm >= M)
            + Vp * 4 * gm           # bias
            + Mp * Vp * 4           # logits write
        ),
    )

    out = pl.pallas_call(
        _lm_head_kernel,
        out_shape=jax.ShapeDtypeStruct((Mp, Vp), jnp.float32),
        grid_spec=pltpu.PrefetchScalarGridSpec(
            num_scalar_prefetch=0,
            grid=(gm, gn, gk),
            in_specs=[
                pl.BlockSpec((tm, tk), lambda i, j, k: (i, k)),
                pl.BlockSpec((tk, tn), lambda i, j, k: (k, j)),
                pl.BlockSpec((1, tn), lambda i, j, k: (0, j)),
            ],
            out_specs=pl.BlockSpec((tm, tn), lambda i, j, k: (i, j)),
        ),
        compiler_params=pltpu.CompilerParams(
            dimension_semantics=("parallel", "parallel", "arbitrary"),
            vmem_limit_bytes=vmem_limit,
        ),
        cost_estimate=cost,
    )(x_bf, w_bf, b2)

    if (Mp, Vp) != (M, V):
        out = out[:M, :V]
    return out


# --------------------------------------------------------------------------
# Minimal encoder-decoder model matching FairseqModel.forward semantics
# --------------------------------------------------------------------------
class FairseqModelJAX:
    """forward(src_tokens, src_lengths, prev_output_tokens[, src_distance])
    -> (B, T, V) logits."""

    def __init__(self, src_vocab, tgt_vocab, hidden, key):
        k1, k2, k3, k4 = jax.random.split(key, 4)
        self.src_vocab = src_vocab
        self.tgt_vocab = tgt_vocab
        self.hidden = hidden

        Hp = _round_up(hidden, 128)
        Vp = _round_up(tgt_vocab, 128)
        w = jax.random.normal(k3, (hidden, tgt_vocab), jnp.float32) * 0.02
        bvec = jax.random.normal(k4, (tgt_vocab,), jnp.float32) * 0.01
        # Pre-pad + pre-cast the output projection ONCE (no per-forward padded
        # weight copy in HBM); bf16 weights are MXU-native and halve weight traffic.
        w_pad = jnp.pad(w, ((0, Hp - hidden), (0, Vp - tgt_vocab))).astype(jnp.bfloat16)
        b_pad = jnp.pad(bvec, (0, Vp - tgt_vocab)).astype(jnp.float32)

        self.params = dict(
            src_embed=jax.random.normal(k1, (src_vocab, hidden), jnp.float32) * 0.02,
            tgt_embed=jax.random.normal(k2, (tgt_vocab, hidden), jnp.float32) * 0.02,
            w_out=w_pad,      # (Hp, Vp) bf16
            b_out=b_pad,      # (Vp,)   f32
        )

        tgt_vocab_ = tgt_vocab
        hidden_ = hidden

        def _fwd(params, src_tokens, src_lengths, prev_output_tokens):
            ctx = FairseqModelJAX._encode(params, src_tokens, src_lengths)   # (B, H)
            B, T = prev_output_tokens.shape
            h = jnp.take(params["tgt_embed"], prev_output_tokens, axis=0)    # (B, T, H)
            h = h + ctx[:, None, :]
            h_flat = h.reshape(B * T, hidden_)
            # TODO(synk): if the logits feed straight into softmax/cross-entropy,
            # fuse the row-max/LSE (and label gather) into the kernel's last-K
            # step to avoid writing the full (M, V) f32 logits to HBM.
            logits = lm_head_pallas(h_flat, params["w_out"], params["b_out"])
            return logits[:, :tgt_vocab_].reshape(B, T, tgt_vocab_)

        # jit the whole forward so the cast/pad/reshape/slice glue fuses.
        self._jit_forward = jax.jit(_fwd)

    # ----- encoder: embedding + length-masked mean pool (plain-JAX glue) -----
    @staticmethod
    def _encode(params, src_tokens, src_lengths):
        B, S = src_tokens.shape
        emb = jnp.take(params["src_embed"], src_tokens, axis=0)          # (B, S, H)
        mask = (jnp.arange(S)[None, :] < src_lengths[:, None]).astype(jnp.float32)
        denom = jnp.maximum(src_lengths, 1).astype(jnp.float32)[:, None]
        return (emb * mask[..., None]).sum(axis=1) / denom               # (B, H)

    def encoder(self, src_tokens, src_lengths, src_distance=None):
        del src_distance  # accepted for API parity, unused
        return self._encode(self.params, src_tokens, src_lengths)

    def decoder(self, prev_output_tokens, encoder_out):
        B, T = prev_output_tokens.shape
        h = jnp.take(self.params["tgt_embed"], prev_output_tokens, axis=0)
        h = h + encoder_out[:, None, :]
        h_flat = h.reshape(B * T, self.hidden)
        logits = lm_head_pallas(h_flat, self.params["w_out"], self.params["b_out"])
        return logits[:, : self.tgt_vocab].reshape(B, T, self.tgt_vocab)

    def forward(self, src_tokens, src_lengths, prev_output_tokens, src_distance=None):
        del src_distance  # accepted for API parity, unused
        return self._jit_forward(self.params, src_tokens, src_lengths, prev_output_tokens)

    def max_positions(self):
        return (None, None)

    # TODO(synk): fairseq host-side utilities (upgrade_state_dict,
    # make_generation_fast_, ONNX export prep) have no Pallas equivalent.


if __name__ == "__main__":
    key = jax.random.PRNGKey(0)
    k_model, k_src, k_tgt, k_len = jax.random.split(key, 4)

    B, S, T, H, V = 2, 10, 8, 128, 256
    model = FairseqModelJAX(src_vocab=V, tgt_vocab=V, hidden=H, key=k_model)

    src_tokens = jax.random.randint(k_src, (B, S), 0, V, dtype=jnp.int32)
    prev_output_tokens = jax.random.randint(k_tgt, (B, T), 0, V, dtype=jnp.int32)
    src_lengths = jax.random.randint(k_len, (B,), 3, S + 1, dtype=jnp.int32)

    logits = model.forward(src_tokens, src_lengths, prev_output_tokens)
    logits = jax.block_until_ready(logits)
    assert logits.shape == (B, T, V)

    # Plain-JAX reference (same bf16 matmul inputs, f32 accumulation).
    ctx = model.encoder(src_tokens, src_lengths)
    h = jnp.take(model.params["tgt_embed"], prev_output_tokens, axis=0) + ctx[:, None, :]
    h_flat = h.reshape(B * T, H).astype(jnp.bfloat16)
    w_ref = model.params["w_out"][:H, :V]
    b_ref = model.params["b_out"][:V]
    ref = (
        jnp.dot(h_flat, w_ref, preferred_element_type=jnp.float32) + b_ref
    ).reshape(B, T, V)
    assert jnp.allclose(logits, ref, atol=1e-3, rtol=1e-3), float(
        jnp.max(jnp.abs(logits - ref))
    )

    print("KERNEL_OK")
</pallas_src>

<mosaic_0001>
module attributes {stable_mosaic.version = 11 : i64} {
  func.func @_lm_head_kernel(%arg0: i32, %arg1: i32, %arg2: i32, %arg3: memref<16x128xbf16, #tpu.memory_space<vmem>>, %arg4: memref<128x256xbf16, #tpu.memory_space<vmem>>, %arg5: memref<1x256xf32, #tpu.memory_space<vmem>>, %arg6: memref<16x256xf32, #tpu.memory_space<vmem>>) attributes {dimension_semantics = [#tpu.dimension_semantics<parallel>, #tpu.dimension_semantics<parallel>, #tpu.dimension_semantics<arbitrary>], iteration_bounds = array<i64: 1, 1, 1>, scalar_prefetch = 0 : i64, scratch_operands = 0 : i64, tpu.core_type = #tpu.core_type<tc>, window_params = [{transform_indices = @transform_0, window_bounds = array<i64: 16, 128>}, {transform_indices = @transform_1, window_bounds = array<i64: 128, 256>}, {transform_indices = @transform_2, window_bounds = array<i64: 1, 256>}, {transform_indices = @transform_3, window_bounds = array<i64: 16, 256>}]} {
    %c0_i32 = arith.constant 0 : i32
    %0 = arith.cmpi eq, %arg2, %c0_i32 : i32
    %1 = arith.extui %0 : i1 to i32
    %c0_i32_0 = arith.constant 0 : i32
    %2 = arith.cmpi ne, %1, %c0_i32_0 : i32
    scf.if %2 {
      %c0_8 = arith.constant 0 : index
      %c0_9 = arith.constant 0 : index
      %9 = vector.load %arg5[%c0_8, %c0_9] : memref<1x256xf32, #tpu.memory_space<vmem>>, vector<1x256xf32>
      %10 = vector.shape_cast %9 : vector<1x256xf32> to vector<1x256xf32>
      %11 = vector.broadcast %10 : vector<1x256xf32> to vector<16x256xf32>
      %c0_10 = arith.constant 0 : index
      %c0_11 = arith.constant 0 : index
      %12 = vector.load %arg6[%c0_10, %c0_11] : memref<16x256xf32, #tpu.memory_space<vmem>>, vector<16x256xf32>
      tpu.vector_store %arg6[%c0_10, %c0_11], %11 {strides = array<i32>} : memref<16x256xf32, #tpu.memory_space<vmem>>, vector<16x256xf32>,
    } else {
    }
    %c0 = arith.constant 0 : index
    %c0_1 = arith.constant 0 : index
    %3 = vector.load %arg6[%c0, %c0_1] : memref<16x256xf32, #tpu.memory_space<vmem>>, vector<16x256xf32>
    %c0_2 = arith.constant 0 : index
    %c0_3 = arith.constant 0 : index
    %4 = vector.load %arg3[%c0_2, %c0_3] : memref<16x128xbf16, #tpu.memory_space<vmem>>, vector<16x128xbf16>
    %c0_4 = arith.constant 0 : index
    %c0_5 = arith.constant 0 : index
    %5 = vector.load %arg4[%c0_4, %c0_5] : memref<128x256xbf16, #tpu.memory_space<vmem>>, vector<128x256xbf16>
    %cst = arith.constant dense<0.000000e+00> : vector<16x256xf32>
    %6 = tpu.matmul %4, %5, %cst {dimension_numbers = #tpu.dot_dimension_numbers<[1], [0], [0], [1], [0, 0, 1, 1], [], []>} : vector<16x128xbf16>, vector<128x256xbf16>, vector<16x256xf32> -> vector<16x256xf32>
    %7 = arith.addf %3, %6 : vector<16x256xf32>
    %c0_6 = arith.constant 0 : index
    %c0_7 = arith.constant 0 : index
    %8 = vector.load %arg6[%c0_6, %c0_7] : memref<16x256xf32, #tpu.memory_space<vmem>>, vector<16x256xf32>
    tpu.vector_store %arg6[%c0_6, %c0_7], %7 {strides = array<i32>} : memref<16x256xf32, #tpu.memory_space<vmem>>, vector<16x256xf32>,
    return
  }
  func.func @transform_0(%arg0: i32, %arg1: i32, %arg2: i32) -> (i32, i32) {
    %c0_i32 = arith.constant 0 : i32
    return %arg0, %arg2 : i32, i32
  }
  func.func @transform_1(%arg0: i32, %arg1: i32, %arg2: i32) -> (i32, i32) {
    %c0_i32 = arith.constant 0 : i32
    return %arg2, %arg1 : i32, i32
  }
  func.func @transform_2(%arg0: i32, %arg1: i32, %arg2: i32) -> (i32, i32) {
    %c0_i32 = arith.constant 0 : i32
    %c0_i32_0 = arith.constant 0 : i32
    return %c0_i32, %arg1 : i32, i32
  }
  func.func @transform_3(%arg0: i32, %arg1: i32, %arg2: i32) -> (i32, i32) {
    %c0_i32 = arith.constant 0 : i32
    return %arg0, %arg1 : i32, i32
  }
}

</mosaic_0001>

<bundles_post_ra>
// kernel: _fwd.1
= control target key start
LH: loop header
LB: loop body
LE: loop exit
PB: predicated region body
PF: predicated region fallthrough
CT: control target
= control target key end

     0   :  { %s433_s0 = inlined_call_operand.vmem [shape: bf16[16,128], index: 0, kind: input, shape index: {}]   ;;  %s434_s1 = inlined_call_operand.vmem [shape: bf16[128,256], index: 1, kind: input, shape index: {}]   ;;  %s435_s2 = inlined_call_operand.vmem [shape: f32[1,256], index: 2, kind: input, shape index: {}]   ;;  %s436_s3 = inlined_call_operand.hbm [shape: f32[16,256], index: 3, kind: output, shape index: {}]  }
   0x1   :  { %v253_v0 = vld [vmem:[%s434_s1 + $0x70] sm:$0xf]  ;;  %v275_v1 = vld [vmem:[%s434_s1 + $0x74] sm:$0xf0]  ;;  %v274_v2 = vld [vmem:[%s434_s1 + $0x74] sm:$0xf] }
   0x2   :  { %v254_v3 = vor.u32 %v275_v1, %v253_v0  ;;  %v255_v4 = vld [vmem:[%s434_s1 + $0x78] sm:$0xf0]  ;;  %v245_v5 = vld [vmem:[%s434_s1 + $0x60] sm:$0xf]  ;;  %v273_v6 = vld [vmem:[%s434_s1 + $0x64] sm:$0xf0] }
   0x3   :  { %v258_v7 = vor.u32 %v274_v2, %v255_v4  ;;  %v272_v8 = vld [vmem:[%s434_s1 + $0x64] sm:$0xf]  ;;  %v247_v9 = vld [vmem:[%s434_s1 + $0x68] sm:$0xf0]  ;;  %v246_v10 = vor.u32 %v273_v6, %v245_v5  ;;  %v237_v12 = vld [vmem:[%s434_s1 + $0x50] sm:$0xf] }
   0x4   :  { %137 = vmatpush.bf16.msra.mxu0 %v254_v3  ;;  %v250_v11 = vor.u32 %v272_v8, %v247_v9  ;;  %v271_v13 = vld [vmem:[%s434_s1 + $0x54] sm:$0xf0]  ;;  %v270_v14 = vld [vmem:[%s434_s1 + $0x54] sm:$0xf]  ;;  %v239_v15 = vld [vmem:[%s434_s1 + $0x58] sm:$0xf0] }
   0x5   :  { %151 = vmatpush.bf16.msra.mxu1 %v258_v7  ;;  %v238_v16 = vor.u32 %v271_v13, %v237_v12  ;;  %v242_v17 = vor.u32 %v270_v14, %v239_v15  ;;  %v229_v18 = vld [vmem:[%s434_s1 + $0x40] sm:$0xf]  ;;  %v269_v19 = vld [vmem:[%s434_s1 + $0x44] sm:$0xf0]  ;;  %v268_v20 = vld [vmem:[%s434_s1 + $0x44] sm:$0xf] }
   0x6   :  { %v231_v21 = vld [vmem:[%s434_s1 + $0x48] sm:$0xf0]  ;;  %v230_v22 = vor.u32 %v269_v19, %v229_v18 }
   0x8   :  { %138 = vmatpush.bf16.msra.mxu0 %v246_v10 }
   0x9   :  { %152 = vmatpush.bf16.msra.mxu1 %v250_v11 }
   0xc   :  { %139 = vmatpush.bf16.msra.mxu0 %v238_v16 }
   0xd   :  { %8 = vsyncpa [#allocation3], 0  ;;  %153 = vmatpush.bf16.msra.mxu1 %v242_v17  ;;  %v234_v23 = vor.u32 %v268_v20, %v231_v21  ;;  %v221_v24 = vld [vmem:[%s434_s1 + $0x30] sm:$0xf]  ;;  %v267_v25 = vld [vmem:[%s434_s1 + $0x34] sm:$0xf0] }
   0xe   :  { %v266_v26 = vld [vmem:[%s434_s1 + $0x34] sm:$0xf]  ;;  %v223_v27 = vld [vmem:[%s434_s1 + $0x38] sm:$0xf0]  ;;  %v222_v28 = vor.u32 %v267_v25, %v221_v24  ;;  %v213_v30 = vld [vmem:[%s434_s1 + $0x20] sm:$0xf] }
   0xf   :  { %v226_v29 = vor.u32 %v266_v26, %v223_v27  ;;  %v265_v31 = vld [vmem:[%s434_s1 + $0x24] sm:$0xf0]  ;;  %v264_v32 = vld [vmem:[%s434_s1 + $0x24] sm:$0xf]  ;;  %v215_v33 = vld [vmem:[%s434_s1 + $0x28] sm:$0xf0] }
  0x10   :  { %140 = vmatpush.bf16.msra.mxu0 %v230_v22  ;;  %v214_v34 = vor.u32 %v265_v31, %v213_v30  ;;  %v218_v35 = vor.u32 %v264_v32, %v215_v33  ;;  %v205_v36 = vld [vmem:[%s434_s1 + $0x10] sm:$0xf]  ;;  %v263_v37 = vld [vmem:[%s434_s1 + $0x14] sm:$0xf0]  ;;  %v262_v38 = vld [vmem:[%s434_s1 + $0x14] sm:$0xf] }
  0x11   :  { %154 = vmatpush.bf16.msra.mxu1 %v234_v23  ;;  %v207_v39 = vld [vmem:[%s434_s1 + $0x18] sm:$0xf0]  ;;  %v206_v40 = vor.u32 %v263_v37, %v205_v36  ;;  %v197_v42 = vld [vmem:[%s434_s1] sm:$0xf]  ;;  %v261_v43 = vld [vmem:[%s434_s1 + $0x4] sm:$0xf0] }
  0x12   :  { %v210_v41 = vor.u32 %v262_v38, %v207_v39  ;;  %v260_v44 = vld [vmem:[%s434_s1 + $0x4] sm:$0xf]  ;;  %v199_v45 = vld [vmem:[%s434_s1 + $0x8] sm:$0xf0]  ;;  %v198_v46 = vor.u32 %v261_v43, %v197_v42  ;;  %v19_v49 = vld [vmem:[%s435_s2] sm:$0x3] }
  0x13   :  { %v202_v47 = vor.u32 %v260_v44, %v199_v45  ;;  %v259_v48 = vld [vmem:[%s433_s0] sm:$0xff]  ;;  %v21_v50 = vperm.slane %v19_v49, 0  ;;  %v22_v51 = vperm.slane %v19_v49, 1  ;;  %s305_s1 = smov [#allocation2]   ;;  %s179_s28 = sshll.u32 %s436_s3, 4  ;;  %s180_s28 = int_to_ptr.hbm [resolvable:$true] %s179_s28 }
  0x14   :  { %141 = vmatpush.bf16.msra.mxu0 %v222_v28  ;;  %s177_s26 = sshll.u32 %s305_s1, 4  ;;  %s306_s2 = smov 256   ;;  %s178_s26 = int_to_ptr.vmem [resolvable:$true] %s177_s26 }
  0x15   :  { %155 = vmatpush.bf16.msra.mxu1 %v226_v29  ;;  %s307_s29 = smov 16  }
  0x18   :  { %142 = vmatpush.bf16.msra.mxu0 %v214_v34 }
  0x19   :  { %156 = vmatpush.bf16.msra.mxu1 %v218_v35 }
  0x1c   :  { %143 = vmatpush.bf16.msra.mxu0 %v206_v40 }
  0x1d   :  { %157 = vmatpush.bf16.msra.mxu1 %v210_v41 }
  0x20   :  { %144 = vmatpush.bf16.msra.mxu0 %v198_v46 }
  0x21   :  { %158 = vmatpush.bf16.msra.mxu1 %v202_v47 }
  0x23   :  { %145 = vmatmul.bf16.vlgmr.msra.gmra.mxu0 %v259_v48 }
  0x24   :  { %159 = vmatmul.bf16.vlgmr.msra.gmra.mxu1 %v259_v48 }
  0xa0   :  { %v146_v52 = vpop.f32.mrf.mxu0 }
  0xa1   :  { %v165_v53 = vadd.f32 %v146_v52, %v21_v50  ;;  %v160_v54 = vpop.f32.mrf.mxu1 }
  0xa2   :  { %v166_v55 = vadd.f32 %v160_v54, %v22_v51 }
  0xa3   :  { %169 = vst [vmem:[#allocation2] sm:$0xff] %v165_v53 }
  0xa4   :  { %170 = vst [vmem:[#allocation2 + $0x8] sm:$0xff] %v166_v55 }
  0xa8   :  { %v148_v56 = vpop.f32.mrf.mxu0 }
  0xa9   :  { %v167_v57 = vadd.f32 %v148_v56, %v21_v50  ;;  %v162_v58 = vpop.f32.mrf.mxu1 }
  0xaa   :  { %v168_v59 = vadd.f32 %v162_v58, %v22_v51 }
  0xab   :  { %171 = vst [vmem:[#allocation2 + $0x10] sm:$0xff] %v167_v57 }
  0xac   :  { %172 = vst [vmem:[#allocation2 + $0x18] sm:$0xff] %v168_v59 }
  0xad   :  { %185 = dma.vmem_to_hbm [thread:$0]  %s178_s26, 512, %s180_s28, [#allocation3], %s306_s2, %s306_s2, %s307_s29  }
  0xae   :  { %303 = dma.done.wait [#allocation3], 512  }
  0xaf   :  { %304 = vsyncadd [#allocation3], 4294966784 }
  0xb0   :  { %190 = vsyncpa [#allocation3], 1 }

</bundles_post_ra>
